<compile_context>
chip_gen: v6e
topology: v6e:2x2x1
jax: 0.10.0
libtpu: 0.0.40
codegen_flags: <defaults>
</compile_context>

<pallas_src>
import functools
import math

import jax
import jax.numpy as jnp
from jax.experimental import pallas as pl
from jax.experimental.pallas import tpu as pltpu

# "Module parameters" (BiTemperedLogisticLoss.__init__ stores plain floats).
T1 = 0.8          # t1 < 1.0 (boundedness)
T2 = 1.4          # t2 > 1.0 (tail heaviness)
SMOOTHING = 0.1   # label smoothing
NUM_ITERS = 5

_TINY = 1e-30


# ---------------------------------------------------------------------------
# Helper math.  Power-based versions are used by the pure-JAX reference.
# ---------------------------------------------------------------------------
def _log_t(u, t):
    if t == 1.0:
        return jnp.log(u)
    return (jnp.power(u, 1.0 - t) - 1.0) / (1.0 - t)


def _exp_t(u, t):
    if t == 1.0:
        return jnp.exp(u)
    return jnp.power(jnp.maximum(1.0 + (1.0 - t) * u, 0.0), 1.0 / (1.0 - t))


def _make_pow(base):
    """Static-exponent powers of a strictly positive array.

    Half-integer exponents lower to one rsqrt/sqrt (EUP) plus a short VPU
    multiply chain; the rsqrt/sqrt is cached so several exponents of the same
    base share a single transcendental.  Otherwise falls back to exp(e*log).
    """
    cache = {}

    def _unit(neg):
        key = "r" if neg else "s"
        if key not in cache:
            cache[key] = jax.lax.rsqrt(base) if neg else jnp.sqrt(base)
        return cache[key]

    def pw(e):
        e = float(e)
        n2 = round(2.0 * e)
        if abs(2.0 * e - n2) < 1e-9 and n2 != 0 and abs(n2) <= 16:
            unit = _unit(n2 < 0)
            k = abs(int(n2))
            acc, p = None, unit
            while k:                      # binary exponentiation (muls only)
                if k & 1:
                    acc = p if acc is None else acc * p
                k >>= 1
                if k:
                    p = p * p
            return acc
        return jnp.exp(e * jnp.log(base))

    return pw


# ---------------------------------------------------------------------------
# Pallas kernel.  acts_ref: (C, TB)  (classes on sublanes, batch on lanes)
#                 labels_ref: (1, TB) int32
#                 out_ref: (1, TB) f32 per-example losses (0 for padded lanes)
# ---------------------------------------------------------------------------
def _bi_tempered_kernel(acts_ref, labels_ref, out_ref, *,
                        t1, t2, smoothing, num_iters, n_batch):
    pid = pl.program_id(0)

    acts = acts_ref[...].astype(jnp.float32)      # (C, TB)
    labels = labels_ref[...]                      # (1, TB) int32
    C, TB = acts.shape

    # ---- tempered softmax (class axis = 0 -> sublane reductions) ----------
    if t2 == 1.0:
        mu = jnp.max(acts, axis=0, keepdims=True)
        sh = acts - mu
        log_p = sh - jnp.log(jnp.sum(jnp.exp(sh), axis=0, keepdims=True))
        base = None
    else:
        one_m_t2 = 1.0 - t2
        mu = jnp.max(acts, axis=0, keepdims=True)            # (1, TB)
        norm0 = acts - mu

        def exp_t2(u):
            # exp_t(u, t2) = clamp(1+(1-t2)u)^(1/(1-t2)).  For t2>1 the base
            # is >= 1, so the tiny floor is only a safety net.  The exponent
            # (-2.5 here) goes through the rsqrt + multiply chain.
            b = jnp.maximum(1.0 + one_m_t2 * u, _TINY)
            return _make_pow(b)(1.0 / one_m_t2)

        if t2 > 1.0:
            # Fixed-point iterations (hot path for t2 = 1.4).
            # TODO(synk): offload these class-axis sums to the idle MXU
            # (ones(1,C) @ X) for another ~10-20% once EUP stops binding.
            norm = norm0
            for _ in range(num_iters):
                z = jnp.sum(exp_t2(norm), axis=0, keepdims=True)   # z >= 1
                norm = norm0 * _make_pow(z)(one_m_t2)              # z^(1-t2)
            z = jnp.sum(exp_t2(norm), axis=0, keepdims=True)
            # -log_t(1/z, t2) = (z^(t2-1) - 1) / (t2 - 1)
            logt_part = (_make_pow(z)(t2 - 1.0) - 1.0) / (t2 - 1.0)
            norm_const = mu + logt_part
        else:
            # Binary search (t2 < 1) -- dead code for t2 = 1.4, kept complete.
            eff_dim = jnp.sum((norm0 > -1.0 / one_m_t2).astype(jnp.float32),
                              axis=0, keepdims=True)
            lower = jnp.zeros_like(mu)
            upper = -_log_t(1.0 / eff_dim, t2) * jnp.ones_like(lower)
            for _ in range(num_iters):
                logt_partition = 0.5 * (upper + lower)
                sum_probs = jnp.sum(exp_t2(norm0 - logt_partition),
                                    axis=0, keepdims=True)
                update = (sum_probs < 1.0).astype(jnp.float32)
                lower = lower * update + (1.0 - update) * logt_partition
                upper = upper * (1.0 - update) + update * logt_partition
            norm_const = mu + 0.5 * (upper + lower)

        # p = exp_t(acts - norm_const, t2) = base^(1/(1-t2)) with:
        base = jnp.maximum(1.0 + one_m_t2 * (acts - norm_const), _TINY)

    # ---- loss epilogue -----------------------------------------------------
    if smoothing > 0.0:
        on_val = (1.0 - smoothing * C / (C - 1)) + smoothing / (C - 1)
        off_val = smoothing / (C - 1)
    else:
        on_val, off_val = 1.0, 0.0
    sum_y = on_val + (C - 1) * off_val

    # Trace-time constant: sum_c [ y*log_t(y+eps, t1) - y^(2-t1)/(2-t1) ].
    def _f_const(v):
        if t1 == 1.0:
            lt = math.log(v + 1e-10)
        else:
            lt = ((v + 1e-10) ** (1.0 - t1) - 1.0) / (1.0 - t1)
        return v * lt - (v ** (2.0 - t1)) / (2.0 - t1)

    row_const = _f_const(on_val) + (C - 1) * _f_const(off_val)

    lab_mask = jax.lax.broadcasted_iota(jnp.int32, (C, TB), 0) == labels

    if t1 == 1.0:
        # cross = sum_c y*log(p), tail uses w = p.
        if t2 == 1.0:
            logt_p = log_p
            w = jnp.exp(log_p)
        else:
            logt_p = jnp.log(base) * (1.0 / (1.0 - t2))
            w = _make_pow(base)(1.0 / (1.0 - t2))
        sum_l = jnp.sum(logt_p, axis=0, keepdims=True)
        lab_l = jnp.sum(jnp.where(lab_mask, logt_p, 0.0),
                        axis=0, keepdims=True)
        cross = off_val * sum_l + (on_val - off_val) * lab_l
    else:
        # q = p^(1-t1): cross = sum_c y*(q-1)/(1-t1); tail uses w = p^(2-t1).
        if t2 == 1.0:
            q = jnp.exp((1.0 - t1) * log_p)
            w = jnp.exp((2.0 - t1) * log_p)
        else:
            pwb = _make_pow(base)
            q = pwb((1.0 - t1) / (1.0 - t2))   # rsqrt(base) for (0.8, 1.4)
            w = pwb((2.0 - t1) / (1.0 - t2))   # rsqrt(base)^6 (shares rsqrt)
        sum_q = jnp.sum(q, axis=0, keepdims=True)
        lab_q = jnp.sum(jnp.where(lab_mask, q, 0.0), axis=0, keepdims=True)
        cross = (off_val * sum_q + (on_val - off_val) * lab_q - sum_y) \
            / (1.0 - t1)

    sum_w = jnp.sum(w, axis=0, keepdims=True)
    per_example = row_const - cross + sum_w * (1.0 / (2.0 - t1))   # (1, TB)

    # Ragged last tile: zero lanes past the true batch (NaN-safe select).
    col = pid * TB + jax.lax.broadcasted_iota(jnp.int32, (1, TB), 1)
    out_ref[...] = jnp.where(col < n_batch, per_example, 0.0)


# ---------------------------------------------------------------------------
# Wrapper
# ---------------------------------------------------------------------------
def bi_tempered_logistic_loss_tpu(logits, labels, *, t1=T1, t2=T2,
                                  smoothing=SMOOTHING, num_iters=NUM_ITERS,
                                  block_b=16384):
    """logits: (B, C) float (any dtype), labels: (B,) int -> scalar mean loss."""
    B, C = logits.shape

    # Class-major layout: classes on sublanes, batch on the lane axis
    # (lane-dense for small C).  Native dtype; f32 cast happens in-kernel.
    # TODO(synk): fold this (B,C)->(C,B) relayout into the kernel to recover
    # one HBM pass over the logits (kept out-of-kernel for robustness).
    acts_t = jnp.transpose(logits)                    # (C, B)
    labels_row = labels.reshape(1, B).astype(jnp.int32)

    # Batch tile on the lane axis: as large as block_b (multiple of 128), but
    # split into >= 2 tiles whenever possible so v7x megacore can shard the
    # "parallel" grid axis across its two TensorCores.
    tb_cap = max(128, (int(block_b) // 128) * 128)
    if B <= 256:
        tb = B
    else:
        tb = min(tb_cap, pl.cdiv(B, 256) * 128)
    nb = pl.cdiv(B, tb)

    kernel = functools.partial(
        _bi_tempered_kernel, t1=float(t1), t2=float(t2),
        smoothing=float(smoothing), num_iters=int(num_iters), n_batch=B)

    per_example = pl.pallas_call(
        kernel,
        out_shape=jax.ShapeDtypeStruct((1, nb * tb), jnp.float32),
        grid=(nb,),
        in_specs=[
            pl.BlockSpec((C, tb), lambda i: (0, i)),
            pl.BlockSpec((1, tb), lambda i: (0, i)),
        ],
        out_specs=pl.BlockSpec((1, tb), lambda i: (0, i)),
        compiler_params=pltpu.CompilerParams(
            dimension_semantics=("parallel",),
            vmem_limit_bytes=32 * 1024 * 1024),
    )(acts_t, labels_row)

    # Module forward: bi_tempered_logistic_loss(..., reduction='none').mean()
    return jnp.sum(per_example) * (1.0 / B)


# ---------------------------------------------------------------------------
# Pure-JAX reference (mirrors the PyTorch code, power-based math) for checks.
# ---------------------------------------------------------------------------
def _tempered_softmax_ref(acts, t, num_iters):
    if t == 1.0:
        m = jnp.max(acts, axis=-1, keepdims=True)
        e = jnp.exp(acts - m)
        return e / jnp.sum(e, axis=-1, keepdims=True)
    mu = jnp.max(acts, axis=-1, keepdims=True)
    norm0 = acts - mu
    if t < 1.0:
        eff_dim = jnp.sum((norm0 > -1.0 / (1.0 - t)).astype(jnp.int32),
                          axis=-1, keepdims=True).astype(acts.dtype)
        lower = jnp.zeros_like(mu)
        upper = -_log_t(1.0 / eff_dim, t) * jnp.ones_like(lower)
        for _ in range(num_iters):
            lp = 0.5 * (upper + lower)
            sp = jnp.sum(_exp_t(norm0 - lp, t), axis=-1, keepdims=True)
            upd = (sp < 1.0).astype(acts.dtype)
            lower = lower * upd + (1.0 - upd) * lp
            upper = upper * (1.0 - upd) + upd * lp
        norm_const = 0.5 * (upper + lower) + mu
    else:
        norm = norm0
        for _ in range(num_iters):
            z = jnp.sum(_exp_t(norm, t), axis=-1, keepdims=True)
            norm = norm0 * jnp.power(z, 1.0 - t)
        z = jnp.sum(_exp_t(norm, t), axis=-1, keepdims=True)
        norm_const = -_log_t(1.0 / z, t) + mu
    return _exp_t(acts - norm_const, t)


def _reference_loss(logits, labels, t1, t2, smoothing, num_iters):
    B, C = logits.shape
    onehot = jax.nn.one_hot(labels, C, dtype=jnp.float32)
    if smoothing > 0.0:
        onehot = (1.0 - smoothing * C / (C - 1)) * onehot + smoothing / (C - 1)
    probs = _tempered_softmax_ref(logits.astype(jnp.float32), t2, num_iters)
    lv = (onehot * _log_t(onehot + 1e-10, t1)
          - onehot * _log_t(probs, t1)
          - jnp.power(onehot, 2.0 - t1) / (2.0 - t1)
          + jnp.power(probs, 2.0 - t1) / (2.0 - t1))
    return jnp.mean(jnp.sum(lv, axis=-1))


if __name__ == "__main__":
    key = jax.random.PRNGKey(0)
    k1, k2, k3, k4 = jax.random.split(key, 4)

    # Case 1: small shapes (single tile, block shapes == full array dims).
    B, C = 8, 16
    logits = jax.random.normal(k1, (B, C), dtype=jnp.float32) * 3.0
    labels = jax.random.randint(k2, (B,), 0, C, dtype=jnp.int32)
    loss = jax.block_until_ready(bi_tempered_logistic_loss_tpu(logits, labels))
    ref = jax.block_until_ready(
        _reference_loss(logits, labels, T1, T2, SMOOTHING, NUM_ITERS))
    assert jnp.allclose(loss, ref, atol=2e-4, rtol=2e-4), (loss, ref)

    # Case 2: multi-tile "parallel" grid with a ragged, masked last tile.
    B2, C2 = 300, 16
    logits2 = jax.random.normal(k3, (B2, C2), dtype=jnp.float32) * 3.0
    labels2 = jax.random.randint(k4, (B2,), 0, C2, dtype=jnp.int32)
    loss2 = jax.block_until_ready(
        bi_tempered_logistic_loss_tpu(logits2, labels2, block_b=128))
    ref2 = jax.block_until_ready(
        _reference_loss(logits2, labels2, T1, T2, SMOOTHING, NUM_ITERS))
    assert jnp.allclose(loss2, ref2, atol=2e-4, rtol=2e-4), (loss2, ref2)

    print("KERNEL_OK")
</pallas_src>

<mosaic_0001>
module attributes {stable_mosaic.version = 11 : i64} {
  func.func @_bi_tempered_kernel(%arg0: i32, %arg1: memref<16x8xf32, #tpu.memory_space<vmem>>, %arg2: memref<1x8xi32, #tpu.memory_space<vmem>>, %arg3: memref<1x8xf32, #tpu.memory_space<vmem>>) attributes {dimension_semantics = [#tpu.dimension_semantics<parallel>], iteration_bounds = array<i64: 1>, scalar_prefetch = 0 : i64, scratch_operands = 0 : i64, tpu.core_type = #tpu.core_type<tc>, window_params = [{transform_indices = @transform_0, window_bounds = array<i64: 16, 8>}, {transform_indices = @transform_1, window_bounds = array<i64: 1, 8>}, {transform_indices = @transform_2, window_bounds = array<i64: 1, 8>}]} {
    %c0 = arith.constant 0 : index
    %c0_0 = arith.constant 0 : index
    %0 = vector.load %arg1[%c0, %c0_0] : memref<16x8xf32, #tpu.memory_space<vmem>>, vector<16x8xf32>
    %c0_1 = arith.constant 0 : index
    %c0_2 = arith.constant 0 : index
    %1 = vector.load %arg2[%c0_1, %c0_2] : memref<1x8xi32, #tpu.memory_space<vmem>>, vector<1x8xi32>
    %cst = arith.constant dense<0xFF800000> : vector<8xf32>
    %2 = vector.multi_reduction <maximumf>, %0, %cst [0] : vector<16x8xf32> to vector<8xf32>
    %3 = vector.shape_cast %2 : vector<8xf32> to vector<1x8xf32>
    %4 = vector.broadcast %3 : vector<1x8xf32> to vector<16x8xf32>
    %5 = arith.subf %0, %4 : vector<16x8xf32>
    %cst_3 = arith.constant -4.000000e-01 : f32
    %6 = vector.broadcast %cst_3 : f32 to vector<16x8xf32>
    %7 = arith.mulf %6, %5 : vector<16x8xf32>
    %cst_4 = arith.constant 1.000000e+00 : f32
    %8 = vector.broadcast %cst_4 : f32 to vector<16x8xf32>
    %9 = arith.addf %8, %7 : vector<16x8xf32>
    %cst_5 = arith.constant 1.000000e-30 : f32
    %10 = vector.broadcast %cst_5 : f32 to vector<16x8xf32>
    %11 = arith.maximumf %9, %10 : vector<16x8xf32>
    %12 = math.rsqrt %11 : vector<16x8xf32>
    %13 = arith.mulf %12, %12 : vector<16x8xf32>
    %14 = arith.mulf %13, %13 : vector<16x8xf32>
    %15 = arith.mulf %12, %14 : vector<16x8xf32>
    %cst_6 = arith.constant dense<0.000000e+00> : vector<8xf32>
    %16 = vector.multi_reduction <add>, %15, %cst_6 [0] : vector<16x8xf32> to vector<8xf32>
    %17 = vector.shape_cast %16 : vector<8xf32> to vector<1x8xf32>
    %18 = math.log %17 : vector<1x8xf32>
    %cst_7 = arith.constant -4.000000e-01 : f32
    %19 = vector.broadcast %cst_7 : f32 to vector<1x8xf32>
    %20 = arith.mulf %19, %18 : vector<1x8xf32>
    %21 = math.exp %20 : vector<1x8xf32>
    %22 = vector.broadcast %21 : vector<1x8xf32> to vector<16x8xf32>
    %23 = arith.mulf %5, %22 : vector<16x8xf32>
    %cst_8 = arith.constant -4.000000e-01 : f32
    %24 = vector.broadcast %cst_8 : f32 to vector<16x8xf32>
    %25 = arith.mulf %24, %23 : vector<16x8xf32>
    %cst_9 = arith.constant 1.000000e+00 : f32
    %26 = vector.broadcast %cst_9 : f32 to vector<16x8xf32>
    %27 = arith.addf %26, %25 : vector<16x8xf32>
    %cst_10 = arith.constant 1.000000e-30 : f32
    %28 = vector.broadcast %cst_10 : f32 to vector<16x8xf32>
    %29 = arith.maximumf %27, %28 : vector<16x8xf32>
    %30 = math.rsqrt %29 : vector<16x8xf32>
    %31 = arith.mulf %30, %30 : vector<16x8xf32>
    %32 = arith.mulf %31, %31 : vector<16x8xf32>
    %33 = arith.mulf %30, %32 : vector<16x8xf32>
    %cst_11 = arith.constant dense<0.000000e+00> : vector<8xf32>
    %34 = vector.multi_reduction <add>, %33, %cst_11 [0] : vector<16x8xf32> to vector<8xf32>
    %35 = vector.shape_cast %34 : vector<8xf32> to vector<1x8xf32>
    %36 = math.log %35 : vector<1x8xf32>
    %cst_12 = arith.constant -4.000000e-01 : f32
    %37 = vector.broadcast %cst_12 : f32 to vector<1x8xf32>
    %38 = arith.mulf %37, %36 : vector<1x8xf32>
    %39 = math.exp %38 : vector<1x8xf32>
    %40 = vector.broadcast %39 : vector<1x8xf32> to vector<16x8xf32>
    %41 = arith.mulf %5, %40 : vector<16x8xf32>
    %cst_13 = arith.constant -4.000000e-01 : f32
    %42 = vector.broadcast %cst_13 : f32 to vector<16x8xf32>
    %43 = arith.mulf %42, %41 : vector<16x8xf32>
    %cst_14 = arith.constant 1.000000e+00 : f32
    %44 = vector.broadcast %cst_14 : f32 to vector<16x8xf32>
    %45 = arith.addf %44, %43 : vector<16x8xf32>
    %cst_15 = arith.constant 1.000000e-30 : f32
    %46 = vector.broadcast %cst_15 : f32 to vector<16x8xf32>
    %47 = arith.maximumf %45, %46 : vector<16x8xf32>
    %48 = math.rsqrt %47 : vector<16x8xf32>
    %49 = arith.mulf %48, %48 : vector<16x8xf32>
    %50 = arith.mulf %49, %49 : vector<16x8xf32>
    %51 = arith.mulf %48, %50 : vector<16x8xf32>
    %cst_16 = arith.constant dense<0.000000e+00> : vector<8xf32>
    %52 = vector.multi_reduction <add>, %51, %cst_16 [0] : vector<16x8xf32> to vector<8xf32>
    %53 = vector.shape_cast %52 : vector<8xf32> to vector<1x8xf32>
    %54 = math.log %53 : vector<1x8xf32>
    %cst_17 = arith.constant -4.000000e-01 : f32
    %55 = vector.broadcast %cst_17 : f32 to vector<1x8xf32>
    %56 = arith.mulf %55, %54 : vector<1x8xf32>
    %57 = math.exp %56 : vector<1x8xf32>
    %58 = vector.broadcast %57 : vector<1x8xf32> to vector<16x8xf32>
    %59 = arith.mulf %5, %58 : vector<16x8xf32>
    %cst_18 = arith.constant -4.000000e-01 : f32
    %60 = vector.broadcast %cst_18 : f32 to vector<16x8xf32>
    %61 = arith.mulf %60, %59 : vector<16x8xf32>
    %cst_19 = arith.constant 1.000000e+00 : f32
    %62 = vector.broadcast %cst_19 : f32 to vector<16x8xf32>
    %63 = arith.addf %62, %61 : vector<16x8xf32>
    %cst_20 = arith.constant 1.000000e-30 : f32
    %64 = vector.broadcast %cst_20 : f32 to vector<16x8xf32>
    %65 = arith.maximumf %63, %64 : vector<16x8xf32>
    %66 = math.rsqrt %65 : vector<16x8xf32>
    %67 = arith.mulf %66, %66 : vector<16x8xf32>
    %68 = arith.mulf %67, %67 : vector<16x8xf32>
    %69 = arith.mulf %66, %68 : vector<16x8xf32>
    %cst_21 = arith.constant dense<0.000000e+00> : vector<8xf32>
    %70 = vector.multi_reduction <add>, %69, %cst_21 [0] : vector<16x8xf32> to vector<8xf32>
    %71 = vector.shape_cast %70 : vector<8xf32> to vector<1x8xf32>
    %72 = math.log %71 : vector<1x8xf32>
    %cst_22 = arith.constant -4.000000e-01 : f32
    %73 = vector.broadcast %cst_22 : f32 to vector<1x8xf32>
    %74 = arith.mulf %73, %72 : vector<1x8xf32>
    %75 = math.exp %74 : vector<1x8xf32>
    %76 = vector.broadcast %75 : vector<1x8xf32> to vector<16x8xf32>
    %77 = arith.mulf %5, %76 : vector<16x8xf32>
    %cst_23 = arith.constant -4.000000e-01 : f32
    %78 = vector.broadcast %cst_23 : f32 to vector<16x8xf32>
    %79 = arith.mulf %78, %77 : vector<16x8xf32>
    %cst_24 = arith.constant 1.000000e+00 : f32
    %80 = vector.broadcast %cst_24 : f32 to vector<16x8xf32>
    %81 = arith.addf %80, %79 : vector<16x8xf32>
    %cst_25 = arith.constant 1.000000e-30 : f32
    %82 = vector.broadcast %cst_25 : f32 to vector<16x8xf32>
    %83 = arith.maximumf %81, %82 : vector<16x8xf32>
    %84 = math.rsqrt %83 : vector<16x8xf32>
    %85 = arith.mulf %84, %84 : vector<16x8xf32>
    %86 = arith.mulf %85, %85 : vector<16x8xf32>
    %87 = arith.mulf %84, %86 : vector<16x8xf32>
    %cst_26 = arith.constant dense<0.000000e+00> : vector<8xf32>
    %88 = vector.multi_reduction <add>, %87, %cst_26 [0] : vector<16x8xf32> to vector<8xf32>
    %89 = vector.shape_cast %88 : vector<8xf32> to vector<1x8xf32>
    %90 = math.log %89 : vector<1x8xf32>
    %cst_27 = arith.constant -4.000000e-01 : f32
    %91 = vector.broadcast %cst_27 : f32 to vector<1x8xf32>
    %92 = arith.mulf %91, %90 : vector<1x8xf32>
    %93 = math.exp %92 : vector<1x8xf32>
    %94 = vector.broadcast %93 : vector<1x8xf32> to vector<16x8xf32>
    %95 = arith.mulf %5, %94 : vector<16x8xf32>
    %cst_28 = arith.constant -4.000000e-01 : f32
    %96 = vector.broadcast %cst_28 : f32 to vector<16x8xf32>
    %97 = arith.mulf %96, %95 : vector<16x8xf32>
    %cst_29 = arith.constant 1.000000e+00 : f32
    %98 = vector.broadcast %cst_29 : f32 to vector<16x8xf32>
    %99 = arith.addf %98, %97 : vector<16x8xf32>
    %cst_30 = arith.constant 1.000000e-30 : f32
    %100 = vector.broadcast %cst_30 : f32 to vector<16x8xf32>
    %101 = arith.maximumf %99, %100 : vector<16x8xf32>
    %102 = math.rsqrt %101 : vector<16x8xf32>
    %103 = arith.mulf %102, %102 : vector<16x8xf32>
    %104 = arith.mulf %103, %103 : vector<16x8xf32>
    %105 = arith.mulf %102, %104 : vector<16x8xf32>
    %cst_31 = arith.constant dense<0.000000e+00> : vector<8xf32>
    %106 = vector.multi_reduction <add>, %105, %cst_31 [0] : vector<16x8xf32> to vector<8xf32>
    %107 = vector.shape_cast %106 : vector<8xf32> to vector<1x8xf32>
    %108 = math.log %107 : vector<1x8xf32>
    %cst_32 = arith.constant 4.000000e-01 : f32
    %109 = vector.broadcast %cst_32 : f32 to vector<1x8xf32>
    %110 = arith.mulf %109, %108 : vector<1x8xf32>
    %111 = math.exp %110 : vector<1x8xf32>
    %cst_33 = arith.constant 1.000000e+00 : f32
    %112 = vector.broadcast %cst_33 : f32 to vector<1x8xf32>
    %113 = arith.subf %111, %112 : vector<1x8xf32>
    %cst_34 = arith.constant 4.000000e-01 : f32
    %114 = vector.broadcast %cst_34 : f32 to vector<1x8xf32>
    %115 = arith.divf %113, %114 : vector<1x8xf32>
    %116 = arith.addf %3, %115 : vector<1x8xf32>
    %117 = vector.broadcast %116 : vector<1x8xf32> to vector<16x8xf32>
    %118 = arith.subf %0, %117 : vector<16x8xf32>
    %cst_35 = arith.constant -4.000000e-01 : f32
    %119 = vector.broadcast %cst_35 : f32 to vector<16x8xf32>
    %120 = arith.mulf %119, %118 : vector<16x8xf32>
    %cst_36 = arith.constant 1.000000e+00 : f32
    %121 = vector.broadcast %cst_36 : f32 to vector<16x8xf32>
    %122 = arith.addf %121, %120 : vector<16x8xf32>
    %cst_37 = arith.constant 1.000000e-30 : f32
    %123 = vector.broadcast %cst_37 : f32 to vector<16x8xf32>
    %124 = arith.maximumf %122, %123 : vector<16x8xf32>
    %125 = tpu.iota {dimensions = array<i32: 0>} : vector<16x8xi32>
    %126 = vector.broadcast %1 : vector<1x8xi32> to vector<16x8xi32>
    %127 = arith.cmpi eq, %125, %126 : vector<16x8xi32>
    %128 = math.rsqrt %124 : vector<16x8xf32>
    %129 = arith.mulf %128, %128 : vector<16x8xf32>
    %130 = arith.mulf %129, %129 : vector<16x8xf32>
    %131 = arith.mulf %129, %130 : vector<16x8xf32>
    %cst_38 = arith.constant dense<0.000000e+00> : vector<8xf32>
    %132 = vector.multi_reduction <add>, %128, %cst_38 [0] : vector<16x8xf32> to vector<8xf32>
    %133 = vector.shape_cast %132 : vector<8xf32> to vector<1x8xf32>
    %cst_39 = arith.constant 0.000000e+00 : f32
    %134 = vector.broadcast %cst_39 : f32 to vector<16x8xf32>
    %135 = arith.select %127, %128, %134 : vector<16x8xi1>, vector<16x8xf32>
    %cst_40 = arith.constant dense<0.000000e+00> : vector<8xf32>
    %136 = vector.multi_reduction <add>, %135, %cst_40 [0] : vector<16x8xf32> to vector<8xf32>
    %137 = vector.shape_cast %136 : vector<8xf32> to vector<1x8xf32>
    %cst_41 = arith.constant 0.00666666683 : f32
    %138 = vector.broadcast %cst_41 : f32 to vector<1x8xf32>
    %139 = arith.mulf %138, %133 : vector<1x8xf32>
    %cst_42 = arith.constant 0.893333315 : f32
    %140 = vector.broadcast %cst_42 : f32 to vector<1x8xf32>
    %141 = arith.mulf %140, %137 : vector<1x8xf32>
    %142 = arith.addf %139, %141 : vector<1x8xf32>
    %cst_43 = arith.constant 1.000000e+00 : f32
    %143 = vector.broadcast %cst_43 : f32 to vector<1x8xf32>
    %144 = arith.subf %142, %143 : vector<1x8xf32>
    %cst_44 = arith.constant 2.000000e-01 : f32
    %145 = vector.broadcast %cst_44 : f32 to vector<1x8xf32>
    %146 = arith.divf %144, %145 : vector<1x8xf32>
    %cst_45 = arith.constant dense<0.000000e+00> : vector<8xf32>
    %147 = vector.multi_reduction <add>, %131, %cst_45 [0] : vector<16x8xf32> to vector<8xf32>
    %148 = vector.shape_cast %147 : vector<8xf32> to vector<1x8xf32>
    %cst_46 = arith.constant -1.17523623 : f32
    %149 = vector.broadcast %cst_46 : f32 to vector<1x8xf32>
    %150 = arith.subf %149, %146 : vector<1x8xf32>
    %cst_47 = arith.constant 0.833333313 : f32
    %151 = vector.broadcast %cst_47 : f32 to vector<1x8xf32>
    %152 = arith.mulf %148, %151 : vector<1x8xf32>
    %153 = arith.addf %150, %152 : vector<1x8xf32>
    %c8_i32 = arith.constant 8 : i32
    %154 = arith.muli %arg0, %c8_i32 : i32
    %155 = tpu.iota {dimensions = array<i32: 1>} : vector<1x8xi32>
    %156 = vector.broadcast %154 : i32 to vector<1x8xi32>
    %157 = arith.addi %156, %155 : vector<1x8xi32>
    %c8_i32_48 = arith.constant 8 : i32
    %158 = vector.broadcast %c8_i32_48 : i32 to vector<1x8xi32>
    %159 = arith.cmpi slt, %157, %158 : vector<1x8xi32>
    %cst_49 = arith.constant 0.000000e+00 : f32
    %160 = vector.broadcast %cst_49 : f32 to vector<1x8xf32>
    %161 = arith.select %159, %153, %160 : vector<1x8xi1>, vector<1x8xf32>
    %c0_50 = arith.constant 0 : index
    %c0_51 = arith.constant 0 : index
    %162 = vector.load %arg3[%c0_50, %c0_51] : memref<1x8xf32, #tpu.memory_space<vmem>>, vector<1x8xf32>
    tpu.vector_store %arg3[%c0_50, %c0_51], %161 {strides = array<i32>} : memref<1x8xf32, #tpu.memory_space<vmem>>, vector<1x8xf32>,
    return
  }
  func.func @transform_0(%arg0: i32) -> (i32, i32) {
    %c0_i32 = arith.constant 0 : i32
    %c0_i32_0 = arith.constant 0 : i32
    return %c0_i32, %arg0 : i32, i32
  }
  func.func @transform_1(%arg0: i32) -> (i32, i32) {
    %c0_i32 = arith.constant 0 : i32
    %c0_i32_0 = arith.constant 0 : i32
    return %c0_i32, %arg0 : i32, i32
  }
  func.func @transform_2(%arg0: i32) -> (i32, i32) {
    %c0_i32 = arith.constant 0 : i32
    %c0_i32_0 = arith.constant 0 : i32
    return %c0_i32, %arg0 : i32, i32
  }
}

</mosaic_0001>

<bundles_post_ra>
// kernel: tpu_custom_call.1
= control target key start
LH: loop header
LB: loop body
LE: loop exit
PB: predicated region body
PF: predicated region fallthrough
CT: control target
= control target key end

     0   :  { %7 = vsyncpa [#allocation3], 0  ;;  %vm15_vm0 = vcmask 64512   ;;  %vm279_vm4 = vcmask 57344   ;;  %s452_s0 = inlined_call_operand.vmem [shape: f32[16,8], index: 0, kind: input, shape index: {}]   ;;  %s453_s1 = inlined_call_operand.vmem [shape: s32[1,8], index: 1, kind: input, shape index: {}]   ;;  %s454_s2 = inlined_call_operand.hbm [shape: f32[1,8], index: 2, kind: output, shape index: {}]  }
   0x1   :  { %v392_v0 = vld [vmem:[%s452_s0] sm:$0xff]  ;;  %v397_v1 = vld [vmem:[%s452_s0 + $0x8] sm:$0xff] }
   0x2   :  { %v16_v2 = vsel %vm15_vm0, %v392_v0, -inf  ;;  %v17_v3 = vsel %vm15_vm0, %v397_v1, -inf }
   0x3   :  { %v18_v4 = vmax.f32 %v16_v2, %v17_v3 }
   0x5   :  { %v19_v5 = vrot.slane %v18_v4, 4 }
   0x7   :  { %v20_v6 = vmax.f32 %v18_v4, %v19_v5 }
   0x9   :  { %v21_v7 = vrot.slane %v20_v6, 2 }
   0xb   :  { %v22_v8 = vmax.f32 %v20_v6, %v21_v7 }
   0xd   :  { %v23_v9 = vrot.slane %v22_v8, 1 }
   0xf   :  { %v403_v10 = vmax.f32 %v22_v8, %v23_v9 }
  0x11   :  { %v407_v11 = vsub.f32 %v392_v0, %v403_v10  ;;  %v411_v12 = vsub.f32 %v397_v1, %v403_v10 }
  0x13   :  { %v27_v13 = vmul.f32 -0.4, %v407_v11  ;;  %v28_v14 = vmul.f32 -0.4, %v411_v12 }
  0x15   :  { %v29_v15 = vadd.f32 1.0, %v27_v13  ;;  %v30_v16 = vadd.f32 1.0, %v28_v14 }
  0x17   :  { %v31_v17 = vmax.f32 %v29_v15, 1e-30  ;;  %v32_v18 = vmax.f32 %v30_v16, 1e-30 }
  0x19   :  { %299 = vrsqrt.f32 %v31_v17 }
  0x1a   :  { %301 = vrsqrt.f32 %v32_v18 }
  0x26   :  { %v300_v19 = vpop.eup %299 }
  0x27   :  { %v302_v20 = vpop.eup %301  ;;  %v35_v21 = vmul.f32 %v300_v19, %v300_v19 }
  0x28   :  { %v36_v22 = vmul.f32 %v302_v20, %v302_v20 }
  0x29   :  { %v37_v23 = vmul.f32 %v35_v21, %v35_v21 }
  0x2a   :  { %v38_v24 = vmul.f32 %v36_v22, %v36_v22 }
  0x2b   :  { %v39_v25 = vmul.f32 %v300_v19, %v37_v23 }
  0x2c   :  { %v40_v26 = vmul.f32 %v302_v20, %v38_v24 }
  0x2d   :  { %v41_v27 = vsel %vm15_vm0, %v39_v25, 0.0 }
  0x2e   :  { %v42_v28 = vsel %vm15_vm0, %v40_v26, 0.0 }
  0x2f   :  { %v43_v29 = vadd.f32 %v42_v28, %v41_v27 }
  0x31   :  { %v44_v30 = vrot.slane %v43_v29, 4 }
  0x33   :  { %v45_v31 = vadd.f32 %v44_v30, %v43_v29 }
  0x35   :  { %v46_v32 = vrot.slane %v45_v31, 2 }
  0x37   :  { %v47_v33 = vadd.f32 %v46_v32, %v45_v31 }
  0x39   :  { %v48_v34 = vrot.slane %v47_v33, 1 }
  0x3b   :  { %v49_v35 = vadd.f32 %v48_v34, %v47_v33 }
  0x3d   :  { %303 = vlog2.f32 %v49_v35 }
  0x4a   :  { %v304_v36 = vpop.eup %303 }
  0x4b   :  { %v51_v37 = vmul.f32 0.6931472, %v304_v36 }
  0x4d   :  { %v52_v38 = vmul.f32 -0.4, %v51_v37 }
  0x4f   :  { %v53_v39 = vmul.f32 1.442695, %v52_v38 }
  0x51   :  { %305 = vpow2.f32 %v53_v39 }
  0x5e   :  { %v306_v40 = vpop.eup %305 }
  0x5f   :  { %v55_v41 = vmul.f32 %v306_v40, %v407_v11  ;;  %v56_v42 = vmul.f32 %v306_v40, %v411_v12 }
  0x61   :  { %v57_v43 = vmul.f32 -0.4, %v55_v41  ;;  %v58_v44 = vmul.f32 -0.4, %v56_v42 }
  0x63   :  { %v59_v45 = vadd.f32 1.0, %v57_v43  ;;  %v60_v46 = vadd.f32 1.0, %v58_v44 }
  0x65   :  { %v61_v47 = vmax.f32 %v59_v45, 1e-30  ;;  %v62_v48 = vmax.f32 %v60_v46, 1e-30 }
  0x67   :  { %307 = vrsqrt.f32 %v61_v47 }
  0x68   :  { %309 = vrsqrt.f32 %v62_v48 }
  0x74   :  { %v308_v49 = vpop.eup %307 }
  0x75   :  { %v310_v50 = vpop.eup %309  ;;  %v65_v51 = vmul.f32 %v308_v49, %v308_v49 }
  0x76   :  { %v66_v52 = vmul.f32 %v310_v50, %v310_v50 }
  0x77   :  { %v67_v53 = vmul.f32 %v65_v51, %v65_v51 }
  0x78   :  { %v68_v54 = vmul.f32 %v66_v52, %v66_v52 }
  0x79   :  { %v69_v55 = vmul.f32 %v308_v49, %v67_v53 }
  0x7a   :  { %v70_v56 = vmul.f32 %v310_v50, %v68_v54 }
  0x7b   :  { %v71_v57 = vsel %vm15_vm0, %v69_v55, 0.0 }
  0x7c   :  { %v72_v58 = vsel %vm15_vm0, %v70_v56, 0.0 }
  0x7d   :  { %v73_v59 = vadd.f32 %v72_v58, %v71_v57 }
  0x7f   :  { %v74_v60 = vrot.slane %v73_v59, 4 }
  0x81   :  { %v75_v61 = vadd.f32 %v74_v60, %v73_v59 }
  0x83   :  { %v76_v62 = vrot.slane %v75_v61, 2 }
  0x85   :  { %v77_v63 = vadd.f32 %v76_v62, %v75_v61 }
  0x87   :  { %v78_v2 = vrot.slane %v77_v63, 1 }
  0x89   :  { %v79_v3 = vadd.f32 %v78_v2, %v77_v63 }
  0x8b   :  { %311 = vlog2.f32 %v79_v3 }
  0x98   :  { %v312_v4 = vpop.eup %311 }
  0x99   :  { %v81_v5 = vmul.f32 0.6931472, %v312_v4 }
  0x9b   :  { %v82_v6 = vmul.f32 -0.4, %v81_v5 }
  0x9d   :  { %v83_v7 = vmul.f32 1.442695, %v82_v6 }
  0x9f   :  { %313 = vpow2.f32 %v83_v7 }
  0xac   :  { %v314_v8 = vpop.eup %313 }
  0xad   :  { %v85_v9 = vmul.f32 %v314_v8, %v407_v11  ;;  %v86_v13 = vmul.f32 %v314_v8, %v411_v12 }
  0xaf   :  { %v87_v14 = vmul.f32 -0.4, %v85_v9  ;;  %v88_v15 = vmul.f32 -0.4, %v86_v13 }
  0xb1   :  { %v89_v16 = vadd.f32 1.0, %v87_v14  ;;  %v90_v17 = vadd.f32 1.0, %v88_v15 }
  0xb3   :  { %v91_v18 = vmax.f32 %v89_v16, 1e-30  ;;  %v92_v19 = vmax.f32 %v90_v17, 1e-30 }
  0xb5   :  { %315 = vrsqrt.f32 %v91_v18 }
  0xb6   :  { %317 = vrsqrt.f32 %v92_v19 }
  0xc2   :  { %v316_v20 = vpop.eup %315 }
  0xc3   :  { %v318_v21 = vpop.eup %317  ;;  %v95_v22 = vmul.f32 %v316_v20, %v316_v20 }
  0xc4   :  { %v96_v23 = vmul.f32 %v318_v21, %v318_v21 }
  0xc5   :  { %v97_v24 = vmul.f32 %v95_v22, %v95_v22 }
  0xc6   :  { %v98_v25 = vmul.f32 %v96_v23, %v96_v23 }
  0xc7   :  { %v99_v26 = vmul.f32 %v316_v20, %v97_v24 }
  0xc8   :  { %v100_v27 = vmul.f32 %v318_v21, %v98_v25 }
  0xc9   :  { %v101_v28 = vsel %vm15_vm0, %v99_v26, 0.0 }
  0xca   :  { %v102_v29 = vsel %vm15_vm0, %v100_v27, 0.0 }
  0xcb   :  { %v103_v30 = vadd.f32 %v102_v29, %v101_v28 }
  0xcd   :  { %v104_v31 = vrot.slane %v103_v30, 4 }
  0xcf   :  { %v105_v32 = vadd.f32 %v104_v31, %v103_v30 }
  0xd1   :  { %v106_v33 = vrot.slane %v105_v32, 2 }
  0xd3   :  { %v107_v34 = vadd.f32 %v106_v33, %v105_v32 }
  0xd5   :  { %v108_v35 = vrot.slane %v107_v34, 1 }
  0xd7   :  { %v109_v36 = vadd.f32 %v108_v35, %v107_v34 }
  0xd9   :  { %319 = vlog2.f32 %v109_v36 }
  0xe6   :  { %v320_v37 = vpop.eup %319 }
  0xe7   :  { %v111_v38 = vmul.f32 0.6931472, %v320_v37 }
  0xe9   :  { %v112_v39 = vmul.f32 -0.4, %v111_v38 }
  0xeb   :  { %v113_v40 = vmul.f32 1.442695, %v112_v39 }
  0xed   :  { %321 = vpow2.f32 %v113_v40 }
  0xfa   :  { %v322_v41 = vpop.eup %321 }
  0xfb   :  { %v115_v42 = vmul.f32 %v322_v41, %v407_v11  ;;  %v116_v43 = vmul.f32 %v322_v41, %v411_v12 }
  0xfd   :  { %v117_v44 = vmul.f32 -0.4, %v115_v42  ;;  %v118_v45 = vmul.f32 -0.4, %v116_v43 }
  0xff   :  { %v119_v46 = vadd.f32 1.0, %v117_v44  ;;  %v120_v47 = vadd.f32 1.0, %v118_v45 }
 0x101   :  { %v121_v48 = vmax.f32 %v119_v46, 1e-30  ;;  %v122_v49 = vmax.f32 %v120_v47, 1e-30 }
 0x103   :  { %323 = vrsqrt.f32 %v121_v48 }
 0x104   :  { %325 = vrsqrt.f32 %v122_v49 }
 0x110   :  { %v324_v50 = vpop.eup %323 }
 0x111   :  { %v326_v51 = vpop.eup %325  ;;  %v125_v52 = vmul.f32 %v324_v50, %v324_v50 }
 0x112   :  { %v126_v53 = vmul.f32 %v326_v51, %v326_v51 }
 0x113   :  { %v127_v54 = vmul.f32 %v125_v52, %v125_v52 }
 0x114   :  { %v128_v55 = vmul.f32 %v126_v53, %v126_v53 }
 0x115   :  { %v129_v56 = vmul.f32 %v324_v50, %v127_v54 }
 0x116   :  { %v130_v57 = vmul.f32 %v326_v51, %v128_v55 }
 0x117   :  { %v131_v58 = vsel %vm15_vm0, %v129_v56, 0.0 }
 0x118   :  { %v132_v59 = vsel %vm15_vm0, %v130_v57, 0.0 }
 0x119   :  { %v133_v60 = vadd.f32 %v132_v59, %v131_v58 }
 0x11b   :  { %v134_v61 = vrot.slane %v133_v60, 4 }
 0x11d   :  { %v135_v62 = vadd.f32 %v134_v61, %v133_v60 }
 0x11f   :  { %v136_v63 = vrot.slane %v135_v62, 2 }
 0x121   :  { %v137_v2 = vadd.f32 %v136_v63, %v135_v62 }
 0x123   :  { %v138_v3 = vrot.slane %v137_v2, 1 }
 0x125   :  { %v139_v4 = vadd.f32 %v138_v3, %v137_v2 }
 0x127   :  { %327 = vlog2.f32 %v139_v4 }
 0x134   :  { %v328_v5 = vpop.eup %327 }
 0x135   :  { %v141_v6 = vmul.f32 0.6931472, %v328_v5 }
 0x137   :  { %v142_v7 = vmul.f32 -0.4, %v141_v6 }
 0x139   :  { %v143_v8 = vmul.f32 1.442695, %v142_v7 }
 0x13b   :  { %329 = vpow2.f32 %v143_v8 }
 0x148   :  { %v330_v9 = vpop.eup %329 }
 0x149   :  { %v145_v13 = vmul.f32 %v330_v9, %v407_v11  ;;  %v146_v14 = vmul.f32 %v330_v9, %v411_v12 }
 0x14b   :  { %v147_v15 = vmul.f32 -0.4, %v145_v13  ;;  %v148_v16 = vmul.f32 -0.4, %v146_v14 }
 0x14d   :  { %v149_v17 = vadd.f32 1.0, %v147_v15  ;;  %v150_v18 = vadd.f32 1.0, %v148_v16 }
 0x14f   :  { %v151_v19 = vmax.f32 %v149_v17, 1e-30  ;;  %v152_v20 = vmax.f32 %v150_v18, 1e-30 }
 0x151   :  { %331 = vrsqrt.f32 %v151_v19 }
 0x152   :  { %333 = vrsqrt.f32 %v152_v20 }
 0x15e   :  { %v332_v21 = vpop.eup %331 }
 0x15f   :  { %v334_v22 = vpop.eup %333  ;;  %v155_v23 = vmul.f32 %v332_v21, %v332_v21 }
 0x160   :  { %v156_v24 = vmul.f32 %v334_v22, %v334_v22 }
 0x161   :  { %v157_v25 = vmul.f32 %v155_v23, %v155_v23  ;;  %v217_v23 = vlaneseq }
 0x162   :  { %v158_v26 = vmul.f32 %v156_v24, %v156_v24 }
 0x163   :  { %v159_v27 = vmul.f32 %v332_v21, %v157_v25  ;;  %v218_v24 = vshrl.u32 %v217_v23, 7  ;;  %v296_v25 = vld [vmem:[%s453_s1] ss:$0 sm:$0xff]  ;;  %s373_s1 = smov [#allocation2]  }
 0x164   :  { %v160_v28 = vmul.f32 %v334_v22, %v158_v26  ;;  %s287_s14 = sshll.u32 %s373_s1, 4  ;;  %s288_s14 = int_to_ptr.vmem [resolvable:$true] %s287_s14 }
 0x165   :  { %v161_v29 = vsel %vm15_vm0, %v159_v27, 0.0  ;;  %v219_v26 = vadd.s32 8, %v218_v24  ;;  %vm224_vm1 = vcmp.eq.s32.totalorder %v218_v24, %v296_v25  ;;  %s351_s15 = scalar_lea.vmem %s288_s14, 16  ;;  %s355_s16 = scalar_lea.vmem %s288_s14, 32 }
 0x166   :  { %v162_v30 = vsel %vm15_vm0, %v160_v28, 0.0  ;;  %p352_p0 = scmp.ne.s32.totalorder %s288_s14, %s351_s15  ;;  %p356_p1 = scmp.lt.s32.totalorder %s288_s14, %s288_s14 }
 0x167   :  { %v163_v31 = vadd.f32 %v162_v30, %v161_v29  ;;  %vm225_vm2 = vcmp.eq.s32.totalorder %v219_v26, %v296_v25  ;;  %p357_p2 = scmp.lt.s32.totalorder %s355_s16, %s351_s15 }
 0x169   :  { %v164_v32 = vrot.slane %v163_v31, 4  ;;  %p358_p3 = por %p357_p2, %p356_p1 }
 0x16b   :  { %v165_v33 = vadd.f32 %v164_v32, %v163_v31  ;;  %p359_p4 = pnand %p358_p3, %p352_p0 }
 0x16d   :  { %v166_v34 = vrot.slane %v165_v33, 2 }
 0x16f   :  { %v167_v35 = vadd.f32 %v166_v34, %v165_v33 }
 0x171   :  { %v168_v36 = vrot.slane %v167_v35, 1 }
 0x173   :  { %v169_v37 = vadd.f32 %v168_v36, %v167_v35 }
 0x175   :  { %335 = vlog2.f32 %v169_v37 }
 0x182   :  { %v336_v38 = vpop.eup %335 }
 0x183   :  { %v171_v39 = vmul.f32 0.6931472, %v336_v38 }
 0x185   :  { %v172_v40 = vmul.f32 -0.4, %v171_v39 }
 0x187   :  { %v173_v41 = vmul.f32 1.442695, %v172_v40 }
 0x189   :  { %337 = vpow2.f32 %v173_v41 }
 0x196   :  { %v338_v42 = vpop.eup %337 }
 0x197   :  { %v175_v43 = vmul.f32 %v338_v42, %v407_v11  ;;  %v176_v44 = vmul.f32 %v338_v42, %v411_v12 }
 0x199   :  { %v177_v45 = vmul.f32 -0.4, %v175_v43  ;;  %v178_v46 = vmul.f32 -0.4, %v176_v44 }
 0x19b   :  { %v179_v47 = vadd.f32 1.0, %v177_v45  ;;  %v180_v48 = vadd.f32 1.0, %v178_v46 }
 0x19d   :  { %v181_v49 = vmax.f32 %v179_v47, 1e-30  ;;  %v182_v50 = vmax.f32 %v180_v48, 1e-30 }
 0x19f   :  { %339 = vrsqrt.f32 %v181_v49 }
 0x1a0   :  { %341 = vrsqrt.f32 %v182_v50 }
 0x1ac   :  { %v340_v51 = vpop.eup %339 }
 0x1ad   :  { %v342_v52 = vpop.eup %341  ;;  %v185_v53 = vmul.f32 %v340_v51, %v340_v51 }
 0x1ae   :  { %v186_v54 = vmul.f32 %v342_v52, %v342_v52 }
 0x1af   :  { %v187_v55 = vmul.f32 %v185_v53, %v185_v53 }
 0x1b0   :  { %v188_v56 = vmul.f32 %v186_v54, %v186_v54 }
 0x1b1   :  { %v189_v57 = vmul.f32 %v340_v51, %v187_v55 }
 0x1b2   :  { %v190_v58 = vmul.f32 %v342_v52, %v188_v56 }
 0x1b3   :  { %v191_v11 = vsel %vm15_vm0, %v189_v57, 0.0 }
 0x1b4   :  { %v192_v12 = vsel %vm15_vm0, %v190_v58, 0.0 }
 0x1b5   :  { %v193_v59 = vadd.f32 %v192_v12, %v191_v11 }
 0x1b7   :  { %v194_v60 = vrot.slane %v193_v59, 4 }
 0x1b9   :  { %v195_v61 = vadd.f32 %v194_v60, %v193_v59 }
 0x1bb   :  { %v196_v62 = vrot.slane %v195_v61, 2 }
 0x1bd   :  { %v197_v63 = vadd.f32 %v196_v62, %v195_v61 }
 0x1bf   :  { %v198_v2 = vrot.slane %v197_v63, 1 }
 0x1c1   :  { %v199_v3 = vadd.f32 %v198_v2, %v197_v63  ;;  %v274_v63 = vand.u32 127, %v217_v23 }
 0x1c3   :  { %343 = vlog2.f32 %v199_v3  ;;  %vm277_vm3 = vcmp.lt.s32.totalorder %v274_v63, 8 }
 0x1d0   :  { %v344_v4 = vpop.eup %343 }
 0x1d1   :  { %v201_v5 = vmul.f32 0.6931472, %v344_v4 }
 0x1d3   :  { %v202_v6 = vmul.f32 0.4, %v201_v5 }
 0x1d5   :  { %v203_v7 = vmul.f32 1.442695, %v202_v6 }
 0x1d7   :  { %345 = vpow2.f32 %v203_v7 }
 0x1e4   :  { %v346_v8 = vpop.eup %345 }
 0x1e5   :  { %v295_v9 = vadd.f32 -1.0, %v346_v8 }
 0x1e7   :  { %v207_v13 = vmul.f32 2.5, %v295_v9 }
 0x1e9   :  { %v208_v14 = vadd.f32 %v207_v13, %v403_v10 }
 0x1eb   :  { %v209_v15 = vsub.f32 %v392_v0, %v208_v14  ;;  %v210_v16 = vsub.f32 %v397_v1, %v208_v14 }
 0x1ed   :  { %v211_v17 = vmul.f32 -0.4, %v209_v15  ;;  %v212_v18 = vmul.f32 -0.4, %v210_v16 }
 0x1ef   :  { %v213_v19 = vadd.f32 1.0, %v211_v17  ;;  %v214_v20 = vadd.f32 1.0, %v212_v18 }
 0x1f1   :  { %v215_v21 = vmax.f32 %v213_v19, 1e-30  ;;  %v216_v22 = vmax.f32 %v214_v20, 1e-30 }
 0x1f3   :  { %347 = vrsqrt.f32 %v215_v21 }
 0x1f4   :  { %349 = vrsqrt.f32 %v216_v22 }
 0x200   :  { %v348_v0 = vpop.eup %347 }
 0x201   :  { %v350_v10 = vpop.eup %349  ;;  %v228_v1 = vmul.f32 %v348_v0, %v348_v0  ;;  %v234_v27 = vsel %vm15_vm0, %v348_v0, 0.0  ;;  %v243_v28 = vsel %vm224_vm1, %v348_v0, 0.0 }
 0x202   :  { %v229_v29 = vmul.f32 %v350_v10, %v350_v10  ;;  %v235_v30 = vsel %vm15_vm0, %v350_v10, 0.0  ;;  %v244_v31 = vsel %vm225_vm2, %v350_v10, 0.0  ;;  %v245_v32 = vsel %vm15_vm0, %v243_v28, 0.0 }
 0x203   :  { %v230_v33 = vmul.f32 %v228_v1, %v228_v1  ;;  %v236_v34 = vadd.f32 %v235_v30, %v234_v27  ;;  %v246_v35 = vsel %vm15_vm0, %v244_v31, 0.0 }
 0x204   :  { %v231_v36 = vmul.f32 %v229_v29, %v229_v29  ;;  %v247_v37 = vadd.f32 %v246_v35, %v245_v32 }
 0x205   :  { %v232_v38 = vmul.f32 %v230_v33, %v228_v1  ;;  %v237_v39 = vrot.slane %v236_v34, 4 }
 0x206   :  { %v233_v40 = vmul.f32 %v231_v36, %v229_v29  ;;  %v248_v41 = vrot.slane %v247_v37, 4 }
 0x207   :  { %v238_v42 = vadd.f32 %v237_v39, %v236_v34  ;;  %v260_v43 = vsel %vm15_vm0, %v232_v38, 0.0 }
 0x208   :  { %v249_v44 = vadd.f32 %v248_v41, %v247_v37  ;;  %v261_v45 = vsel %vm15_vm0, %v233_v40, 0.0 }
 0x209   :  { %v239_v46 = vrot.slane %v238_v42, 2  ;;  %v262_v47 = vadd.f32 %v261_v45, %v260_v43 }
 0x20a   :  { %v250_v48 = vrot.slane %v249_v44, 2 }
 0x20b   :  { %v240_v49 = vadd.f32 %v239_v46, %v238_v42  ;;  %v263_v50 = vrot.slane %v262_v47, 4 }
 0x20c   :  { %v251_v51 = vadd.f32 %v250_v48, %v249_v44 }
 0x20d   :  { %v241_v52 = vrot.slane %v240_v49, 1  ;;  %v264_v53 = vadd.f32 %v263_v50, %v262_v47 }
 0x20e   :  { %v252_v54 = vrot.slane %v251_v51, 1 }
 0x20f   :  { %v242_v55 = vadd.f32 %v241_v52, %v240_v49  ;;  %v265_v56 = vrot.slane %v264_v53, 2 }
 0x210   :  { %v253_v57 = vadd.f32 %v252_v54, %v251_v51 }
 0x211   :  { %v254_v58 = vmul.f32 0.006666667, %v242_v55  ;;  %v266_v11 = vadd.f32 %v265_v56, %v264_v53 }
 0x212   :  { %v255_v12 = vmul.f32 0.8933333, %v253_v57 }
 0x213   :  { %v267_v59 = vrot.slane %v266_v11, 1 }
 0x214   :  { %v256_v60 = vadd.f32 %v255_v12, %v254_v58 }
 0x215   :  { %v268_v61 = vadd.f32 %v267_v59, %v266_v11 }
 0x216   :  { %v297_v62 = vadd.f32 -1.0, %v256_v60 }
 0x217   :  { %v270_v3 = vmul.f32 0.8333333, %v268_v61 }
 0x218   :  { %v259_v2 = vmul.f32 5.0, %v297_v62 }
 0x21a   :  { %v269_v4 = vsub.f32 -1.1752362, %v259_v2 }
 0x21c   :  { %v271_v5 = vadd.f32 %v270_v3, %v269_v4 }
 0x21e   :  { %v278_v6 = vsel %vm277_vm3, %v271_v5, 0.0 }
 0x21f   :  { %280 = vst.msk [vmem:[#allocation2] sm:$0x1] %vm279_vm4, %v278_v6 }
 0x220   :  { %362 = shalt.err (!%p359_p4)
}
 0x221   :  { %290 = dma.vmem_to_hbm [thread:$0]  %s288_s14, 16, %s454_s2, [#allocation3]  }
 0x222   :  { %371 = dma.done.wait [#allocation3], 16  }
 0x223   :  { %372 = vsyncadd [#allocation3], 4294967280 }
 0x224   :  { %294 = vsyncpa [#allocation3], 1 }

</bundles_post_ra>
